<compile_context>
chip_gen: v5e
topology: v5e:2x2
jax: 0.10.0
libtpu: 0.0.40
codegen_flags: <defaults>
</compile_context>

<pallas_src>
import math
import functools

import jax
import jax.numpy as jnp
from jax.experimental import pallas as pl
from jax.experimental.pallas import tpu as pltpu

# Constants from the reference module
PI = 0.5
SIGMA_1 = math.exp(-0.0)
SIGMA_2 = math.exp(-6.0)
MU_WEIGHTS = (-0.03, 0.03)
MU_BIAS = (-0.03, 0.03)
RHO_WEIGHTS = (-8.0, -7.0)
RHO_BIAS = (-8.0, -7.0)

_HALF_LOG_2PI = 0.5 * math.log(2.0 * math.pi)
_LOG_PI = math.log(PI)
_MIX_RATIO = (1.0 - PI) / PI
_LOG_SIGMA_1 = math.log(SIGMA_1)
_LOG_SIGMA_2 = math.log(SIGMA_2)
_INV_S1_SQ = 1.0 / (SIGMA_1 * SIGMA_1)
_INV_S2_SQ = 1.0 / (SIGMA_2 * SIGMA_2)


def _mixture_log_prob_sum(w):
    """Scale-mixture prior log prob, summed over all elements -> (1, 1).

    log( pi*N(w;0,s1) + (1-pi)*N(w;0,s2) )
      = ld1 + log(pi) + log1p( ((1-pi)/pi) * exp(ld2 - ld1) )
    Shares the w*w term between the two components (2 EUP ops/element: exp, log1p).
    When exp(ld2 - ld1) underflows this is exactly ld1 + log(pi), i.e. the torch
    reference's fallback branch.
    """
    w2 = w * w
    ld1 = -0.5 * w2 * _INV_S1_SQ - _LOG_SIGMA_1 - _HALF_LOG_2PI
    diff = -0.5 * w2 * (_INV_S2_SQ - _INV_S1_SQ) - (_LOG_SIGMA_2 - _LOG_SIGMA_1)
    mixed = ld1 + _LOG_PI + jnp.log1p(_MIX_RATIO * jnp.exp(diff))
    return jnp.sum(mixed, axis=(-2, -1), keepdims=True)


def _normal_logpdf_sum(x, mu, sigma):
    """sum over all elements of log N(x; mu, sigma) -> (1, 1)."""
    z = (x - mu) / sigma
    lp = -0.5 * z * z - jnp.log(sigma) - _HALF_LOG_2PI
    return jnp.sum(lp, axis=(-2, -1), keepdims=True)


def bayesian_layer_kernel(x_ref, mu_wT_ref, rho_wT_ref, eps_wT_ref,
                          mu_b_ref, rho_b_ref, eps_b_ref,
                          out_ref, stats_ref, *, activation):
    mu_wT = mu_wT_ref[...]       # (In, Out)   resident across the sample grid
    rho_wT = rho_wT_ref[...]     # (In, Out)
    eps_wT = eps_wT_ref[...]     # (In, Out)   per-sample block
    mu_b = mu_b_ref[...]         # (1, Out)
    rho_b = rho_b_ref[...]       # (1, Out)
    eps_b = eps_b_ref[...]       # (1, Out)    per-sample block

    # --- reparameterized weight / bias sample; sigma = log(1 + exp(rho)) as in the
    #     module (matches torch.log(1 + torch.exp(rho)), incl. overflow behavior). ---
    sigma_wT = jnp.log1p(jnp.exp(rho_wT))
    sigma_b = jnp.log1p(jnp.exp(rho_b))
    wT = mu_wT + sigma_wT * eps_wT           # sampled weights, already (In, Out)
    b = mu_b + sigma_b * eps_b               # (1, Out)

    # --- linear: out = x @ W.T + b ; W.T is materialized as wT, so this is a
    #     canonical [B,In] x [In,Out] MXU matmul (no transposed-RHS contraction). ---
    x = x_ref[...]                           # (B, In)
    lin = jax.lax.dot_general(x, wT, (((1,), (0,)), ((), ())),
                              preferred_element_type=jnp.float32)
    lin = lin + b                            # broadcast (1, Out) over batch

    # --- activation (static Python branch; NONE is the module default) ---
    if activation == "relu":
        out = jnp.maximum(lin, 0.0)
    elif activation == "sigmoid":
        out = jax.nn.sigmoid(lin)
    elif activation == "tanh":
        out = jnp.tanh(lin)
    elif activation == "softmax":
        out = jax.nn.log_softmax(lin, axis=1)
    else:  # "none"
        out = lin
    out_ref[...] = out.astype(out_ref.dtype)

    # --- scalar stats: [log_prior, log_posterior] merged into one (1, 2) output ---
    log_prior = _mixture_log_prob_sum(wT) + _mixture_log_prob_sum(b)
    log_post = (_normal_logpdf_sum(wT, mu_wT, sigma_wT) +
                _normal_logpdf_sum(b, mu_b, sigma_b))
    stats_ref[...] = jnp.concatenate([log_prior, log_post], axis=-1)


def bayesian_layer_forward(x, mu_w, rho_w, eps_w, mu_b, rho_b, eps_b,
                           activation="none"):
    """Sample-path forward of BayesianLayer.

    eps_w may be (Out, In) for a single sample (module semantics) or (S, Out, In)
    for S Monte-Carlo samples (grid over S; parameters stay resident in VMEM).
    Returns (output, log_prior, log_posterior).
    """
    B, In = x.shape
    Out, In2 = mu_w.shape
    assert In == In2

    single = (eps_w.ndim == 2)
    if single:
        eps_w = eps_w[None]
        eps_b = eps_b[None]
    S = eps_w.shape[0]

    # Pre-transpose weight params -> (In, Out): MXU gets [M,K]x[K,N]; the elementwise
    # sampling / prior / posterior math is layout-agnostic so results are identical.
    mu_wT = mu_w.T
    rho_wT = rho_w.T
    eps_wT = jnp.swapaxes(eps_w, -1, -2)            # (S, In, Out)
    mu_b2 = mu_b.reshape(1, Out)
    rho_b2 = rho_b.reshape(1, Out)
    eps_b3 = eps_b.reshape(S, 1, Out)

    kernel = functools.partial(bayesian_layer_kernel, activation=activation)

    n_params = In * Out + Out
    cost = pl.CostEstimate(
        flops=int(2 * S * B * In * Out + 10 * S * n_params),
        transcendentals=int(4 * S * n_params),
        bytes_accessed=int(4 * (B * In + 2 * (In * Out + Out)
                                + S * n_params + S * B * Out + 2 * S)),
    )

    out, stats = pl.pallas_call(
        kernel,
        out_shape=(jax.ShapeDtypeStruct((S, B, Out), x.dtype),
                   jax.ShapeDtypeStruct((S, 1, 2), jnp.float32)),
        grid=(S,),
        in_specs=[
            pl.BlockSpec((B, In), lambda s: (0, 0)),             # x         (resident)
            pl.BlockSpec((In, Out), lambda s: (0, 0)),           # mu_wT     (resident)
            pl.BlockSpec((In, Out), lambda s: (0, 0)),           # rho_wT    (resident)
            pl.BlockSpec((None, In, Out), lambda s: (s, 0, 0)),  # eps_wT    (per sample)
            pl.BlockSpec((1, Out), lambda s: (0, 0)),            # mu_b      (resident)
            pl.BlockSpec((1, Out), lambda s: (0, 0)),            # rho_b     (resident)
            pl.BlockSpec((None, 1, Out), lambda s: (s, 0, 0)),   # eps_b     (per sample)
        ],
        out_specs=(
            pl.BlockSpec((None, B, Out), lambda s: (s, 0, 0)),
            pl.BlockSpec((None, 1, 2), lambda s: (s, 0, 0)),
        ),
        compiler_params=pltpu.CompilerParams(
            dimension_semantics=("parallel",)),
        cost_estimate=cost,
    )(x, mu_wT, rho_wT, eps_wT, mu_b2, rho_b2, eps_b3)

    log_prior = stats[:, 0, 0]
    log_post = stats[:, 0, 1]
    if single:
        return out[0], log_prior[0], log_post[0]
    return out, log_prior, log_post


# --------------------------- pure-JAX reference -------------------------------------
def _ref_forward(x, mu_w, rho_w, eps_w, mu_b, rho_b, eps_b):
    sw = jnp.log1p(jnp.exp(rho_w))
    sb = jnp.log1p(jnp.exp(rho_b))
    w = mu_w + sw * eps_w
    b = mu_b + sb * eps_b
    out = x @ w.T + b

    def mix(v):
        ld1 = -0.5 * v * v - _HALF_LOG_2PI
        ld2 = -0.5 * (v / SIGMA_2) ** 2 - math.log(SIGMA_2) - _HALF_LOG_2PI
        e1, e2 = jnp.exp(ld1), jnp.exp(ld2)
        return jnp.sum(jnp.where(e2 > 0.0, jnp.log(PI * e1 + (1.0 - PI) * e2),
                                 ld1 + math.log(PI)))

    def norm(v, mu, sig):
        z = (v - mu) / sig
        return jnp.sum(-0.5 * z * z - jnp.log(sig) - _HALF_LOG_2PI)

    log_prior = mix(w) + mix(b)
    log_post = norm(w, mu_w, sw) + norm(b, mu_b, sb)
    return out, log_prior, log_post


if __name__ == "__main__":
    # Small, deterministic setup: batch=8, input_size=32, output_size=16
    B, IN, OUT = 8, 32, 16
    key = jax.random.PRNGKey(0)
    kx, kmw, krw, kmb, krb, kew, keb, kew2, keb2 = jax.random.split(key, 9)

    x = jax.random.normal(kx, (B, IN), dtype=jnp.float32)

    # Deterministic parameter init matching the module's uniform_ ranges
    mu_w = jax.random.uniform(kmw, (OUT, IN), jnp.float32, *MU_WEIGHTS)
    rho_w = jax.random.uniform(krw, (OUT, IN), jnp.float32, *RHO_WEIGHTS)
    mu_b = jax.random.uniform(kmb, (OUT,), jnp.float32, *MU_BIAS)
    rho_b = jax.random.uniform(krb, (OUT,), jnp.float32, *RHO_BIAS)

    # Standard-normal epsilon (the torch module draws this from Normal(0,1))
    eps_w = jax.random.normal(kew, (OUT, IN), dtype=jnp.float32)
    eps_b = jax.random.normal(keb, (OUT,), dtype=jnp.float32)

    # --- single-sample path (module forward semantics) ---
    out, lp, lq = bayesian_layer_forward(
        x, mu_w, rho_w, eps_w, mu_b, rho_b, eps_b, activation="none")
    jax.block_until_ready((out, lp, lq))

    out_r, lp_r, lq_r = _ref_forward(x, mu_w, rho_w, eps_w, mu_b, rho_b, eps_b)
    assert jnp.allclose(out, out_r, atol=1e-4, rtol=1e-4), "output mismatch"
    assert jnp.allclose(lp, lp_r, atol=1e-2, rtol=1e-4), "log_prior mismatch"
    assert jnp.allclose(lq, lq_r, atol=1e-2, rtol=1e-4), "log_posterior mismatch"

    # --- multi-sample (gridded) path: S Monte-Carlo draws in one pallas_call ---
    S = 4
    eps_wS = jax.random.normal(kew2, (S, OUT, IN), dtype=jnp.float32)
    eps_bS = jax.random.normal(keb2, (S, OUT), dtype=jnp.float32)
    outS, lpS, lqS = bayesian_layer_forward(
        x, mu_w, rho_w, eps_wS, mu_b, rho_b, eps_bS, activation="none")
    jax.block_until_ready((outS, lpS, lqS))
    for s in range(S):
        o_r, p_r, q_r = _ref_forward(x, mu_w, rho_w, eps_wS[s], mu_b, rho_b, eps_bS[s])
        assert jnp.allclose(outS[s], o_r, atol=1e-4, rtol=1e-4)
        assert jnp.allclose(lpS[s], p_r, atol=1e-2, rtol=1e-4)
        assert jnp.allclose(lqS[s], q_r, atol=1e-2, rtol=1e-4)

    print("KERNEL_OK")
</pallas_src>

<mosaic_0001>
module attributes {stable_mosaic.version = 11 : i64} {
  func.func @bayesian_layer_kernel(%arg0: i32, %arg1: memref<8x32xf32, #tpu.memory_space<vmem>>, %arg2: memref<32x16xf32, #tpu.memory_space<vmem>>, %arg3: memref<32x16xf32, #tpu.memory_space<vmem>>, %arg4: memref<1x32x16xf32, #tpu.memory_space<vmem>>, %arg5: memref<1x16xf32, #tpu.memory_space<vmem>>, %arg6: memref<1x16xf32, #tpu.memory_space<vmem>>, %arg7: memref<1x1x16xf32, #tpu.memory_space<vmem>>, %arg8: memref<1x8x16xf32, #tpu.memory_space<vmem>>, %arg9: memref<1x1x2xf32, #tpu.memory_space<vmem>>) attributes {dimension_semantics = [#tpu.dimension_semantics<parallel>], iteration_bounds = array<i64: 1>, scalar_prefetch = 0 : i64, scratch_operands = 0 : i64, tpu.core_type = #tpu.core_type<tc>, window_params = [{pipeline_mode = #tpu.pipeline_mode<synchronous>, transform_indices = @transform_0, window_bounds = array<i64: 8, 32>}, {pipeline_mode = #tpu.pipeline_mode<synchronous>, transform_indices = @transform_1, window_bounds = array<i64: 32, 16>}, {pipeline_mode = #tpu.pipeline_mode<synchronous>, transform_indices = @transform_2, window_bounds = array<i64: 32, 16>}, {transform_indices = @transform_3, window_bounds = array<i64: 1, 32, 16>}, {pipeline_mode = #tpu.pipeline_mode<synchronous>, transform_indices = @transform_4, window_bounds = array<i64: 1, 16>}, {pipeline_mode = #tpu.pipeline_mode<synchronous>, transform_indices = @transform_5, window_bounds = array<i64: 1, 16>}, {transform_indices = @transform_6, window_bounds = array<i64: 1, 1, 16>}, {transform_indices = @transform_7, window_bounds = array<i64: 1, 8, 16>}, {transform_indices = @transform_8, window_bounds = array<i64: 1, 1, 2>}]} {
    %c0 = arith.constant 0 : index
    %c0_0 = arith.constant 0 : index
    %0 = vector.load %arg2[%c0, %c0_0] : memref<32x16xf32, #tpu.memory_space<vmem>>, vector<32x16xf32>
    %c0_1 = arith.constant 0 : index
    %c0_2 = arith.constant 0 : index
    %1 = vector.load %arg3[%c0_1, %c0_2] : memref<32x16xf32, #tpu.memory_space<vmem>>, vector<32x16xf32>
    %c0_3 = arith.constant 0 : index
    %c0_4 = arith.constant 0 : index
    %c0_5 = arith.constant 0 : index
    %2 = vector.load %arg4[%c0_3, %c0_4, %c0_5] : memref<1x32x16xf32, #tpu.memory_space<vmem>>, vector<1x32x16xf32>
    %3 = vector.shape_cast %2 : vector<1x32x16xf32> to vector<32x16xf32>
    %c0_6 = arith.constant 0 : index
    %c0_7 = arith.constant 0 : index
    %4 = vector.load %arg5[%c0_6, %c0_7] : memref<1x16xf32, #tpu.memory_space<vmem>>, vector<1x16xf32>
    %c0_8 = arith.constant 0 : index
    %c0_9 = arith.constant 0 : index
    %5 = vector.load %arg6[%c0_8, %c0_9] : memref<1x16xf32, #tpu.memory_space<vmem>>, vector<1x16xf32>
    %c0_10 = arith.constant 0 : index
    %c0_11 = arith.constant 0 : index
    %c0_12 = arith.constant 0 : index
    %6 = vector.load %arg7[%c0_10, %c0_11, %c0_12] : memref<1x1x16xf32, #tpu.memory_space<vmem>>, vector<1x1x16xf32>
    %7 = vector.shape_cast %6 : vector<1x1x16xf32> to vector<1x16xf32>
    %8 = math.exp %1 : vector<32x16xf32>
    %9 = math.log1p %8 : vector<32x16xf32>
    %10 = math.exp %5 : vector<1x16xf32>
    %11 = math.log1p %10 : vector<1x16xf32>
    %12 = arith.mulf %9, %3 : vector<32x16xf32>
    %13 = arith.addf %0, %12 : vector<32x16xf32>
    %14 = arith.mulf %11, %7 : vector<1x16xf32>
    %15 = arith.addf %4, %14 : vector<1x16xf32>
    %c0_13 = arith.constant 0 : index
    %c0_14 = arith.constant 0 : index
    %16 = vector.load %arg1[%c0_13, %c0_14] : memref<8x32xf32, #tpu.memory_space<vmem>>, vector<8x32xf32>
    %cst = arith.constant dense<0.000000e+00> : vector<8x16xf32>
    %17 = tpu.matmul %16, %13, %cst {dimension_numbers = #tpu.dot_dimension_numbers<[1], [0], [0], [1], [0, 0, 1, 1], [], []>} : vector<8x32xf32>, vector<32x16xf32>, vector<8x16xf32> -> vector<8x16xf32>
    %18 = vector.broadcast %15 : vector<1x16xf32> to vector<8x16xf32>
    %19 = arith.addf %17, %18 : vector<8x16xf32>
    %c0_15 = arith.constant 0 : index
    %c0_16 = arith.constant 0 : index
    %c0_17 = arith.constant 0 : index
    %20 = vector.load %arg8[%c0_15, %c0_16, %c0_17] : memref<1x8x16xf32, #tpu.memory_space<vmem>>, vector<1x8x16xf32>
    %21 = vector.shape_cast %20 : vector<1x8x16xf32> to vector<8x16xf32>
    %22 = vector.shape_cast %19 : vector<8x16xf32> to vector<1x8x16xf32>
    tpu.vector_store %arg8[%c0_15, %c0_16, %c0_17], %22 {strides = array<i32>} : memref<1x8x16xf32, #tpu.memory_space<vmem>>, vector<1x8x16xf32>,
    %23 = arith.mulf %13, %13 : vector<32x16xf32>
    %cst_18 = arith.constant -5.000000e-01 : f32
    %24 = vector.broadcast %cst_18 : f32 to vector<32x16xf32>
    %25 = arith.mulf %24, %23 : vector<32x16xf32>
    %cst_19 = arith.constant 1.000000e+00 : f32
    %26 = vector.broadcast %cst_19 : f32 to vector<32x16xf32>
    %27 = arith.mulf %25, %26 : vector<32x16xf32>
    %cst_20 = arith.constant 0.000000e+00 : f32
    %28 = vector.broadcast %cst_20 : f32 to vector<32x16xf32>
    %29 = arith.subf %27, %28 : vector<32x16xf32>
    %cst_21 = arith.constant 0.918938517 : f32
    %30 = vector.broadcast %cst_21 : f32 to vector<32x16xf32>
    %31 = arith.subf %29, %30 : vector<32x16xf32>
    %cst_22 = arith.constant -5.000000e-01 : f32
    %32 = vector.broadcast %cst_22 : f32 to vector<32x16xf32>
    %33 = arith.mulf %32, %23 : vector<32x16xf32>
    %cst_23 = arith.constant 162753.797 : f32
    %34 = vector.broadcast %cst_23 : f32 to vector<32x16xf32>
    %35 = arith.mulf %33, %34 : vector<32x16xf32>
    %cst_24 = arith.constant -6.000000e+00 : f32
    %36 = vector.broadcast %cst_24 : f32 to vector<32x16xf32>
    %37 = arith.subf %35, %36 : vector<32x16xf32>
    %cst_25 = arith.constant -0.693147182 : f32
    %38 = vector.broadcast %cst_25 : f32 to vector<32x16xf32>
    %39 = arith.addf %31, %38 : vector<32x16xf32>
    %40 = math.exp %37 : vector<32x16xf32>
    %cst_26 = arith.constant 1.000000e+00 : f32
    %41 = vector.broadcast %cst_26 : f32 to vector<32x16xf32>
    %42 = arith.mulf %41, %40 : vector<32x16xf32>
    %43 = math.log1p %42 : vector<32x16xf32>
    %44 = arith.addf %39, %43 : vector<32x16xf32>
    %45 = vector.shape_cast %44 : vector<32x16xf32> to vector<1x32x16xf32>
    %cst_27 = arith.constant dense<0.000000e+00> : vector<1xf32>
    %46 = vector.multi_reduction <add>, %45, %cst_27 [1, 2] : vector<1x32x16xf32> to vector<1xf32>
    %47 = vector.shape_cast %46 : vector<1xf32> to vector<1x1x1xf32>
    %48 = vector.extract %47[0, 0, 0] : f32 from vector<1x1x1xf32>
    %49 = vector.broadcast %48 : f32 to vector<1x1xf32>
    %50 = arith.mulf %15, %15 : vector<1x16xf32>
    %cst_28 = arith.constant -5.000000e-01 : f32
    %51 = vector.broadcast %cst_28 : f32 to vector<1x16xf32>
    %52 = arith.mulf %51, %50 : vector<1x16xf32>
    %cst_29 = arith.constant 1.000000e+00 : f32
    %53 = vector.broadcast %cst_29 : f32 to vector<1x16xf32>
    %54 = arith.mulf %52, %53 : vector<1x16xf32>
    %cst_30 = arith.constant 0.000000e+00 : f32
    %55 = vector.broadcast %cst_30 : f32 to vector<1x16xf32>
    %56 = arith.subf %54, %55 : vector<1x16xf32>
    %cst_31 = arith.constant 0.918938517 : f32
    %57 = vector.broadcast %cst_31 : f32 to vector<1x16xf32>
    %58 = arith.subf %56, %57 : vector<1x16xf32>
    %cst_32 = arith.constant -5.000000e-01 : f32
    %59 = vector.broadcast %cst_32 : f32 to vector<1x16xf32>
    %60 = arith.mulf %59, %50 : vector<1x16xf32>
    %cst_33 = arith.constant 162753.797 : f32
    %61 = vector.broadcast %cst_33 : f32 to vector<1x16xf32>
    %62 = arith.mulf %60, %61 : vector<1x16xf32>
    %cst_34 = arith.constant -6.000000e+00 : f32
    %63 = vector.broadcast %cst_34 : f32 to vector<1x16xf32>
    %64 = arith.subf %62, %63 : vector<1x16xf32>
    %cst_35 = arith.constant -0.693147182 : f32
    %65 = vector.broadcast %cst_35 : f32 to vector<1x16xf32>
    %66 = arith.addf %58, %65 : vector<1x16xf32>
    %67 = math.exp %64 : vector<1x16xf32>
    %cst_36 = arith.constant 1.000000e+00 : f32
    %68 = vector.broadcast %cst_36 : f32 to vector<1x16xf32>
    %69 = arith.mulf %68, %67 : vector<1x16xf32>
    %70 = math.log1p %69 : vector<1x16xf32>
    %71 = arith.addf %66, %70 : vector<1x16xf32>
    %72 = vector.shape_cast %71 : vector<1x16xf32> to vector<1x1x16xf32>
    %cst_37 = arith.constant dense<0.000000e+00> : vector<1xf32>
    %73 = vector.multi_reduction <add>, %72, %cst_37 [1, 2] : vector<1x1x16xf32> to vector<1xf32>
    %74 = vector.shape_cast %73 : vector<1xf32> to vector<1x1x1xf32>
    %75 = vector.extract %74[0, 0, 0] : f32 from vector<1x1x1xf32>
    %76 = vector.broadcast %75 : f32 to vector<1x1xf32>
    %77 = arith.addf %49, %76 : vector<1x1xf32>
    %78 = arith.subf %13, %0 : vector<32x16xf32>
    %79 = arith.divf %78, %9 : vector<32x16xf32>
    %cst_38 = arith.constant -5.000000e-01 : f32
    %80 = vector.broadcast %cst_38 : f32 to vector<32x16xf32>
    %81 = arith.mulf %80, %79 : vector<32x16xf32>
    %82 = arith.mulf %81, %79 : vector<32x16xf32>
    %83 = math.log %9 : vector<32x16xf32>
    %84 = arith.subf %82, %83 : vector<32x16xf32>
    %cst_39 = arith.constant 0.918938517 : f32
    %85 = vector.broadcast %cst_39 : f32 to vector<32x16xf32>
    %86 = arith.subf %84, %85 : vector<32x16xf32>
    %87 = vector.shape_cast %86 : vector<32x16xf32> to vector<1x32x16xf32>
    %cst_40 = arith.constant dense<0.000000e+00> : vector<1xf32>
    %88 = vector.multi_reduction <add>, %87, %cst_40 [1, 2] : vector<1x32x16xf32> to vector<1xf32>
    %89 = vector.shape_cast %88 : vector<1xf32> to vector<1x1x1xf32>
    %90 = vector.extract %89[0, 0, 0] : f32 from vector<1x1x1xf32>
    %91 = vector.broadcast %90 : f32 to vector<1x1xf32>
    %92 = arith.subf %15, %4 : vector<1x16xf32>
    %93 = arith.divf %92, %11 : vector<1x16xf32>
    %cst_41 = arith.constant -5.000000e-01 : f32
    %94 = vector.broadcast %cst_41 : f32 to vector<1x16xf32>
    %95 = arith.mulf %94, %93 : vector<1x16xf32>
    %96 = arith.mulf %95, %93 : vector<1x16xf32>
    %97 = math.log %11 : vector<1x16xf32>
    %98 = arith.subf %96, %97 : vector<1x16xf32>
    %cst_42 = arith.constant 0.918938517 : f32
    %99 = vector.broadcast %cst_42 : f32 to vector<1x16xf32>
    %100 = arith.subf %98, %99 : vector<1x16xf32>
    %101 = vector.shape_cast %100 : vector<1x16xf32> to vector<1x1x16xf32>
    %cst_43 = arith.constant dense<0.000000e+00> : vector<1xf32>
    %102 = vector.multi_reduction <add>, %101, %cst_43 [1, 2] : vector<1x1x16xf32> to vector<1xf32>
    %103 = vector.shape_cast %102 : vector<1xf32> to vector<1x1x1xf32>
    %104 = vector.extract %103[0, 0, 0] : f32 from vector<1x1x1xf32>
    %105 = vector.broadcast %104 : f32 to vector<1x1xf32>
    %106 = arith.addf %91, %105 : vector<1x1xf32>
    %107 = tpu.concatenate %77, %106 in 1 : vector<1x1xf32>, vector<1x1xf32> -> vector<1x2xf32>
    %c0_44 = arith.constant 0 : index
    %c0_45 = arith.constant 0 : index
    %c0_46 = arith.constant 0 : index
    %108 = vector.load %arg9[%c0_44, %c0_45, %c0_46] : memref<1x1x2xf32, #tpu.memory_space<vmem>>, vector<1x1x2xf32>
    %109 = vector.shape_cast %108 : vector<1x1x2xf32> to vector<1x2xf32>
    %110 = vector.shape_cast %107 : vector<1x2xf32> to vector<1x1x2xf32>
    tpu.vector_store %arg9[%c0_44, %c0_45, %c0_46], %110 {strides = array<i32>} : memref<1x1x2xf32, #tpu.memory_space<vmem>>, vector<1x1x2xf32>,
    return
  }
  func.func @transform_0(%arg0: i32) -> (i32, i32) {
    %c0_i32 = arith.constant 0 : i32
    %c0_i32_0 = arith.constant 0 : i32
    %c0_i32_1 = arith.constant 0 : i32
    return %c0_i32, %c0_i32_0 : i32, i32
  }
  func.func @transform_1(%arg0: i32) -> (i32, i32) {
    %c0_i32 = arith.constant 0 : i32
    %c0_i32_0 = arith.constant 0 : i32
    %c0_i32_1 = arith.constant 0 : i32
    return %c0_i32, %c0_i32_0 : i32, i32
  }
  func.func @transform_2(%arg0: i32) -> (i32, i32) {
    %c0_i32 = arith.constant 0 : i32
    %c0_i32_0 = arith.constant 0 : i32
    %c0_i32_1 = arith.constant 0 : i32
    return %c0_i32, %c0_i32_0 : i32, i32
  }
  func.func @transform_3(%arg0: i32) -> (i32, i32, i32) {
    %c0_i32 = arith.constant 0 : i32
    %c0_i32_0 = arith.constant 0 : i32
    %c0_i32_1 = arith.constant 0 : i32
    return %arg0, %c0_i32, %c0_i32_0 : i32, i32, i32
  }
  func.func @transform_4(%arg0: i32) -> (i32, i32) {
    %c0_i32 = arith.constant 0 : i32
    %c0_i32_0 = arith.constant 0 : i32
    %c0_i32_1 = arith.constant 0 : i32
    return %c0_i32, %c0_i32_0 : i32, i32
  }
  func.func @transform_5(%arg0: i32) -> (i32, i32) {
    %c0_i32 = arith.constant 0 : i32
    %c0_i32_0 = arith.constant 0 : i32
    %c0_i32_1 = arith.constant 0 : i32
    return %c0_i32, %c0_i32_0 : i32, i32
  }
  func.func @transform_6(%arg0: i32) -> (i32, i32, i32) {
    %c0_i32 = arith.constant 0 : i32
    %c0_i32_0 = arith.constant 0 : i32
    %c0_i32_1 = arith.constant 0 : i32
    return %arg0, %c0_i32, %c0_i32_0 : i32, i32, i32
  }
  func.func @transform_7(%arg0: i32) -> (i32, i32, i32) {
    %c0_i32 = arith.constant 0 : i32
    %c0_i32_0 = arith.constant 0 : i32
    %c0_i32_1 = arith.constant 0 : i32
    return %arg0, %c0_i32, %c0_i32_0 : i32, i32, i32
  }
  func.func @transform_8(%arg0: i32) -> (i32, i32, i32) {
    %c0_i32 = arith.constant 0 : i32
    %c0_i32_0 = arith.constant 0 : i32
    %c0_i32_1 = arith.constant 0 : i32
    return %arg0, %c0_i32, %c0_i32_0 : i32, i32, i32
  }
}

</mosaic_0001>

<bundles_post_ra>
// kernel: tpu_custom_call.1
= control target key start
LH: loop header
LB: loop body
LE: loop exit
PB: predicated region body
PF: predicated region fallthrough
CT: control target
= control target key end

     0   :  { %14 = vsyncpa [#allocation3], 0  ;;  %s911_s0 = inlined_call_operand.vmem [shape: f32[8,32], index: 0, kind: input, shape index: {}]   ;;  %s912_s1 = inlined_call_operand.vmem [shape: f32[32,16], index: 1, kind: input, shape index: {}]   ;;  %s913_s2 = inlined_call_operand.vmem [shape: f32[32,16], index: 2, kind: input, shape index: {}]   ;;  %s914_s3 = inlined_call_operand.vmem [shape: f32[1,32,16], index: 3, kind: input, shape index: {}]   ;;  %s915_s4 = inlined_call_operand.vmem [shape: f32[1,16], index: 4, kind: input, shape index: {}]   ;;  %s916_s5 = inlined_call_operand.vmem [shape: f32[1,16], index: 5, kind: input, shape index: {}]   ;;  %s917_s6 = inlined_call_operand.vmem [shape: f32[1,1,16], index: 6, kind: input, shape index: {}]   ;;  %s918_s7 = inlined_call_operand.hbm [shape: f32[1,8,16], index: 7, kind: output, shape index: {0}]   ;;  %s919_s8 = inlined_call_operand.hbm [shape: f32[1,1,2], index: 8, kind: output, shape index: {1}]  }
   0x1   :  { %v34_v0 = vld [vmem:[%s913_s2] sm:$0xff]  ;;  %v35_v1 = vld [vmem:[%s913_s2 + $0x8] sm:$0xff]  ;;  %v36_v2 = vld [vmem:[%s913_s2 + $0x10] sm:$0xff] }
   0x2   :  { %v37_v3 = vld [vmem:[%s913_s2 + $0x18] sm:$0xff]  ;;  %v45_v4 = vmul.f32 1.442695, %v34_v0  ;;  %v47_v5 = vmul.f32 1.442695, %v35_v1 }
   0x3   :  { %v49_v6 = vmul.f32 1.442695, %v36_v2  ;;  %v51_v7 = vmul.f32 1.442695, %v37_v3  ;;  %v43_v8 = vld [vmem:[%s916_s5] sm:$0x1] }
   0x4   :  { %461 = vpow2.f32 %v45_v4 }
   0x5   :  { %463 = vpow2.f32 %v47_v5 }
   0x6   :  { %15 = vsyncpa [#allocation5], 0  ;;  %465 = vpow2.f32 %v49_v6  ;;  %v89_v9 = vmul.f32 1.442695, %v43_v8  ;;  %v38_v35 = vld [vmem:[%s914_s3] sm:$0xff]  ;;  %v39_v39 = vld [vmem:[%s914_s3 + $0x8] sm:$0xff] }
   0x7   :  { %467 = vpow2.f32 %v51_v7  ;;  %v40_v42 = vld [vmem:[%s914_s3 + $0x10] sm:$0xff]  ;;  %v653_v48 = vld [vmem:[%s912_s1] sm:$0xff]  ;;  %v662_v51 = vld [vmem:[%s912_s1 + $0x8] sm:$0xff]  ;;  %s410_s12 = sshll.u32 %s918_s7, 4  ;;  %s574_s5 = smov [#allocation4]   ;;  %s411_s12 = int_to_ptr.hbm [resolvable:$true] %s410_s12 }
   0x8   :  { %469 = vpow2.f32 %v89_v9  ;;  %v41_v52 = vld [vmem:[%s914_s3 + $0x18] sm:$0xff]  ;;  %v674_v57 = vld [vmem:[%s912_s1 + $0x10] sm:$0xff]  ;;  %s419_s15 = sshll.u32 %s574_s5, 4  ;;  %s421_s18 = sshll.u32 %s919_s8, 4  ;;  %s420_s15 = int_to_ptr.vmem [resolvable:$true] %s419_s15  ;;  %s422_s18 = int_to_ptr.hbm [resolvable:$true] %s421_s18 }
   0x9   :  { %v682_v60 = vld [vmem:[%s912_s1 + $0x18] sm:$0xff] }
   0xa   :  { %v462_v10 = vpop.eup %461 }
   0xb   :  { %v464_v11 = vpop.eup %463  ;;  %v53_v12 = vadd.f32 1.0, %v462_v10  ;;  %v56_v13 = vmul.f32 -0.5, %v462_v10  ;;  %v59_v21 = vand.u32 2147483647, %v462_v10 }
   0xc   :  { %v466_v14 = vpop.eup %465  ;;  %v62_v15 = vadd.f32 1.0, %v464_v11  ;;  %v65_v16 = vmul.f32 -0.5, %v464_v11  ;;  %v68_v24 = vand.u32 2147483647, %v464_v11 }
   0xd   :  { %v468_v17 = vpop.eup %467  ;;  %471 = vlog2.f32 %v53_v12  ;;  %v71_v18 = vadd.f32 1.0, %v466_v14  ;;  %v57_v19 = vadd.f32 1.0, %v56_v13  ;;  %v74_v20 = vmul.f32 -0.5, %v466_v14 }
   0xe   :  { %473 = vlog2.f32 %v62_v15  ;;  %v66_v22 = vadd.f32 1.0, %v65_v16  ;;  %v80_v23 = vadd.f32 1.0, %v468_v17  ;;  %v83_v26 = vmul.f32 -0.5, %v468_v17  ;;  %v635_v28 = vpop.eup %469 }
   0xf   :  { %475 = vlog2.f32 %v71_v18  ;;  %v75_v25 = vadd.f32 1.0, %v74_v20  ;;  %v77_v27 = vand.u32 2147483647, %v466_v14  ;;  %v58_v29 = vmul.f32 %v462_v10, %v57_v19 }
  0x10   :  { %477 = vlog2.f32 %v80_v23  ;;  %v84_v30 = vadd.f32 1.0, %v83_v26  ;;  %vm60_vm0 = vcmp.lt.f32.partialorder %v59_v21, 0.0004427343  ;;  %v67_v32 = vmul.f32 %v464_v11, %v66_v22 }
  0x11   :  { %v86_v33 = vand.u32 2147483647, %v468_v17  ;;  %vm69_vm1 = vcmp.lt.f32.partialorder %v68_v24, 0.0004427343  ;;  %v76_v37 = vmul.f32 %v466_v14, %v75_v25  ;;  %vm78_vm2 = vcmp.lt.f32.partialorder %v77_v27, 0.0004427343 }
  0x12   :  { %v91_v41 = vadd.f32 1.0, %v635_v28  ;;  %v85_v45 = vmul.f32 %v468_v17, %v84_v30  ;;  %v94_v46 = vmul.f32 -0.5, %v635_v28 }
  0x13   :  { %v472_v31 = vpop.eup %471  ;;  %vm87_vm3 = vcmp.lt.f32.partialorder %v86_v33, 0.0004427343 }
  0x14   :  { %v474_v34 = vpop.eup %473  ;;  %v55_v36 = vmul.f32 0.6931472, %v472_v31  ;;  %v687_v62 = vadd.f32 1.0, %v94_v46 }
  0x15   :  { %v476_v38 = vpop.eup %475  ;;  %v64_v40 = vmul.f32 0.6931472, %v474_v34 }
  0x16   :  { %v647_v43 = vsel %vm60_vm0, %v58_v29, %v55_v36  ;;  %v73_v44 = vmul.f32 0.6931472, %v476_v38  ;;  %v478_v47 = vpop.eup %477 }
  0x17   :  { %v655_v49 = vsel %vm69_vm1, %v67_v32, %v64_v40  ;;  %v100_v50 = vmul.f32 %v647_v43, %v38_v35  ;;  %479 = vrcp.f32 %v647_v43  ;;  %v82_v54 = vmul.f32 0.6931472, %v478_v47 }
  0x18   :  { %v667_v53 = vsel %vm78_vm2, %v76_v37, %v73_v44  ;;  %v101_v55 = vmul.f32 %v655_v49, %v39_v39  ;;  %v273_v56 = vand.u32 2147483647, %v647_v43  ;;  %v275_v59 = vand.u32 2147483648, %v647_v43 }
  0x19   :  { %v102_v58 = vmul.f32 %v667_v53, %v40_v42  ;;  %481 = vrcp.f32 %v655_v49  ;;  %v684_v61 = vsel %vm87_vm3, %v85_v45, %v82_v54  ;;  %vm269_vm4 = vweird.f32 %v647_v43 }
  0x1a   :  { %483 = vlog2.f32 %v91_v41  ;;  %v103_v63 = vmul.f32 %v684_v61, %v41_v52  ;;  %v691_v0 = vadd.f32 %v100_v50, %v653_v48  ;;  %v694_v1 = vadd.f32 %v101_v55, %v662_v51 }
  0x1b   :  { %vm284_vm5 = vweird.f32 %v655_v49  ;;  %v698_v2 = vadd.f32 %v102_v58, %v674_v57  ;;  %vm700_vm6 = vcmp.eq.f32.partialorder %v273_v56, 8.507059e+37  ;;  %v288_v4 = vand.u32 2147483647, %v655_v49 }
  0x1c   :  { %v290_v5 = vand.u32 2147483648, %v655_v49  ;;  %485 = vrcp.f32 %v667_v53  ;;  %v708_v7 = vadd.f32 %v103_v63, %v682_v60  ;;  %v260_v8 = vsub.f32 %v691_v0, %v653_v48 }
  0x1d   :  { %v480_v6 = vpop.eup %479  ;;  %v276_v9 = vor.u32 1.1754944e-38, %v275_v59  ;;  %v303_v10 = vand.u32 2147483647, %v667_v53  ;;  %v261_v11 = vsub.f32 %v694_v1, %v662_v51  ;;  %v262_v12 = vsub.f32 %v698_v2, %v674_v57 }
  0x1e   :  { %v265_v13 = vmul.f32 %v480_v6, %v647_v43  ;;  %vm299_vm7 = vweird.f32 %v667_v53  ;;  %vm270_vm8 = vweird.f32 %v480_v6  ;;  %vm719_vm9 = vcmp.eq.f32.partialorder %v288_v4, 8.507059e+37  ;;  %130 = vmatpush.msra.mxu0 %v708_v7 }
  0x1f   :  { %v482_v14 = vpop.eup %481  ;;  %v305_v16 = vand.u32 2147483648, %v667_v53  ;;  %487 = vrcp.f32 %v684_v61  ;;  %v263_v18 = vsub.f32 %v708_v7, %v682_v60  ;;  %v291_v21 = vor.u32 1.1754944e-38, %v290_v5  ;;  %vm743_vm12 = vmor %vm269_vm4, %vm270_vm8 }
  0x20   :  { %v726_v17 = vpop.eup %483  ;;  %v266_v19 = vsub.f32 1.0, %v265_v13  ;;  %v280_v20 = vmul.f32 %v482_v14, %v655_v49  ;;  %vm285_vm10 = vweird.f32 %v482_v14  ;;  %vm731_vm11 = vcmp.eq.f32.partialorder %v303_v10, 8.507059e+37  ;;  %131 = vmatpush.msra.mxu0 %v698_v2 }
  0x21   :  { %v318_v23 = vand.u32 2147483647, %v684_v61  ;;  %489 = vlog2.f32 %v647_v43  ;;  %v320_v27 = vand.u32 2147483648, %v684_v61  ;;  %v306_v31 = vor.u32 1.1754944e-38, %v305_v16  ;;  %vm756_vm15 = vmor %vm284_vm5, %vm285_vm10 }
  0x22   :  { %v486_v24 = vpop.eup %485  ;;  %v267_v25 = vmul.f32 %v480_v6, %v266_v19  ;;  %v281_v26 = vsub.f32 1.0, %v280_v20  ;;  %491 = vlog2.f32 %v655_v49  ;;  %vm314_vm13 = vweird.f32 %v684_v61  ;;  %132 = vmatpush.msra.mxu0 %v694_v1 }
  0x23   :  { %v295_v30 = vmul.f32 %v486_v24, %v667_v53  ;;  %v140_v32 = vmul.f32 %v691_v0, %v691_v0  ;;  %vm300_vm14 = vweird.f32 %v486_v24  ;;  %493 = vlog2.f32 %v667_v53 }
  0x24   :  { %v268_v33 = vadd.f32 %v480_v6, %v267_v25  ;;  %v282_v34 = vmul.f32 %v482_v14, %v281_v26  ;;  %vm760_vm0 = vcmp.eq.f32.partialorder %v318_v23, 8.507059e+37  ;;  %495 = vlog2.f32 %v684_v61  ;;  %133 = vmatpush.msra.mxu0 %v691_v0  ;;  %vm782_vm2 = vmor %vm299_vm7, %vm300_vm14 }
  0x25   :  { %v488_v35 = vpop.eup %487  ;;  %v296_v37 = vsub.f32 1.0, %v295_v30  ;;  %v141_v39 = vmul.f32 %v694_v1, %v694_v1  ;;  %v321_v43 = vor.u32 1.1754944e-38, %v320_v27  ;;  %vm138_vm1 = vcmask 130048  }
  0x26   :  { %v272_v40 = vsel %vm743_vm12, %v480_v6, %v268_v33  ;;  %v283_v41 = vadd.f32 %v482_v14, %v282_v34  ;;  %v310_v42 = vmul.f32 %v488_v35, %v684_v61  ;;  %v142_v47 = vmul.f32 %v698_v2, %v698_v2 }
  0x27   :  { %v490_v44 = vpop.eup %489  ;;  %v277_v45 = vsel %vm700_vm6, %v276_v9, %v272_v40  ;;  %v297_v46 = vmul.f32 %v486_v24, %v296_v37  ;;  %v143_v48 = vmul.f32 %v708_v7, %v708_v7  ;;  %vm315_vm3 = vweird.f32 %v488_v35 }
  0x28   :  { %v492_v49 = vpop.eup %491  ;;  %v278_v50 = vmul.f32 %v277_v45, %v260_v8  ;;  %v287_v52 = vsel %vm756_vm15, %v482_v14, %v283_v41  ;;  %v311_v55 = vsub.f32 1.0, %v310_v42  ;;  %v144_v59 = vmul.f32 -0.5, %v140_v32  ;;  %vm795_vm4 = vmor %vm314_vm13, %vm315_vm3 }
  0x29   :  { %v292_v56 = vsel %vm719_vm9, %v291_v21, %v287_v52  ;;  %v298_v58 = vadd.f32 %v486_v24, %v297_v46  ;;  %v145_v63 = vmul.f32 -0.5, %v141_v39  ;;  %v494_v0 = vpop.eup %493  ;;  %v333_v53 = vmul.f32 0.6931472, %v490_v44 }
  0x2a   :  { %v293_v3 = vmul.f32 %v292_v56, %v261_v11  ;;  %v312_v4 = vmul.f32 %v488_v35, %v311_v55  ;;  %v324_v5 = vmul.f32 -0.5, %v278_v50  ;;  %v496_v6 = vpop.eup %495  ;;  %v335_v10 = vmul.f32 0.6931472, %v492_v49 }
  0x2b   :  { %v302_v8 = vsel %vm782_vm2, %v486_v24, %v298_v58  ;;  %v146_v13 = vmul.f32 -0.5, %v142_v47  ;;  %v147_v14 = vmul.f32 -0.5, %v143_v48  ;;  %v337_v19 = vmul.f32 0.6931472, %v494_v0 }
  0x2c   :  { %v307_v51 = vsel %vm731_vm11, %v306_v31, %v302_v8  ;;  %v313_v1 = vadd.f32 %v488_v35, %v312_v4  ;;  %v325_v11 = vmul.f32 -0.5, %v293_v3  ;;  %v328_v15 = vmul.f32 %v324_v5, %v278_v50  ;;  %v44_v50 = vld [vmem:[%s917_s6] sm:$0x1] }
  0x2d   :  { %v308_v16 = vmul.f32 %v307_v51, %v262_v12  ;;  %v339_v20 = vmul.f32 0.6931472, %v496_v6  ;;  %v97_v61 = vand.u32 2147483647, %v635_v28  ;;  %v152_v25 = vmul.f32 162753.8, %v144_v59 }
  0x2e   :  { %v317_v21 = vsel %vm795_vm4, %v488_v35, %v313_v1  ;;  %v329_v23 = vmul.f32 %v325_v11, %v293_v3  ;;  %v340_v24 = vsub.f32 %v328_v15, %v333_v53  ;;  %v153_v27 = vmul.f32 162753.8, %v145_v63 }
  0x2f   :  { %v322_v22 = vsel %vm760_vm0, %v321_v43, %v317_v21  ;;  %v326_v26 = vmul.f32 -0.5, %v308_v16  ;;  %v154_v29 = vmul.f32 162753.8, %v146_v13  ;;  %v155_v30 = vmul.f32 162753.8, %v147_v14 }
  0x30   :  { %v323_v57 = vmul.f32 %v322_v22, %v263_v18  ;;  %v341_v2 = vsub.f32 %v329_v23, %v335_v10  ;;  %v446_v12 = vadd.f32 -0.9189385, %v340_v24  ;;  %v440_v32 = vadd.f32 6.0, %v152_v25 }
  0x31   :  { %v330_v31 = vmul.f32 %v326_v26, %v308_v16  ;;  %v441_v33 = vadd.f32 6.0, %v153_v27  ;;  %v442_v34 = vadd.f32 6.0, %v154_v29  ;;  %v443_v38 = vadd.f32 6.0, %v155_v30 }
  0x32   :  { %v327_v35 = vmul.f32 -0.5, %v323_v57  ;;  %v447_v36 = vadd.f32 -0.9189385, %v341_v2  ;;  %v348_v37 = vsel %vm138_vm1, %v446_v12, 0.0  ;;  %v436_v40 = vadd.f32 -0.9189385, %v144_v59 }
  0x33   :  { %v342_v39 = vsub.f32 %v330_v31, %v337_v19  ;;  %v437_v41 = vadd.f32 -0.9189385, %v145_v63  ;;  %v96_v42 = vmul.f32 %v635_v28, %v687_v62  ;;  %v438_v18 = vadd.f32 -0.9189385, %v146_v13  ;;  %v828_v63 = vld [vmem:[%s915_s4] sm:$0x1] }
  0x34   :  { %v331_v60 = vmul.f32 %v327_v35, %v323_v57  ;;  %v349_v7 = vsel %vm138_vm1, %v447_v36, 0.0  ;;  %v164_v43 = vmul.f32 1.442695, %v440_v32  ;;  %v166_v46 = vmul.f32 1.442695, %v441_v33  ;;  %v110_v36 = vld [vmem:[%s911_s0] sm:$0xff] }
  0x35   :  { %v448_v44 = vadd.f32 -0.9189385, %v342_v39  ;;  %v350_v45 = vadd.f32 %v349_v7, %v348_v37  ;;  %v168_v47 = vmul.f32 1.442695, %v442_v34  ;;  %v170_v49 = vmul.f32 1.442695, %v443_v38 }
  0x36   :  { %v343_v48 = vsub.f32 %v331_v60, %v339_v20  ;;  %497 = vpow2.f32 %v164_v43  ;;  %v93_v52 = vmul.f32 0.6931472, %v726_v17  ;;  %v439_v62 = vadd.f32 -0.9189385, %v147_v14  ;;  %s573_s0 = smov [#allocation2]  }
  0x37   :  { %v351_v28 = vsel %vm138_vm1, %v448_v44, 0.0  ;;  %499 = vpow2.f32 %v166_v46  ;;  %vm98_vm5 = vcmp.lt.f32.partialorder %v97_v61, 0.0004427343  ;;  %v831_v0 = vadd.f32 -0.6931472, %v436_v40  ;;  %s408_s9 = sshll.u32 %s573_s0, 4  ;;  %s409_s9 = int_to_ptr.vmem [resolvable:$true] %s408_s9 }
  0x38   :  { %v449_v54 = vadd.f32 -0.9189385, %v343_v48  ;;  %v352_v55 = vadd.f32 %v351_v28, %v350_v45  ;;  %501 = vpow2.f32 %v168_v47  ;;  %v821_v56 = vsel %vm98_vm5, %v96_v42, %v93_v52 }
  0x39   :  { %503 = vpow2.f32 %v170_v49  ;;  %v108_v58 = vmul.f32 %v821_v56, %v44_v50  ;;  %v833_v4 = vadd.f32 -0.6931472, %v437_v41  ;;  %v835_v5 = vadd.f32 -0.6931472, %v438_v18 }
  0x3a   :  { %v353_v59 = vsel %vm138_vm1, %v449_v54, 0.0  ;;  %505 = vrcp.f32 %v821_v56  ;;  %v837_v53 = vadd.f32 -0.6931472, %v439_v62  ;;  %v375_v13 = vand.u32 2147483647, %v821_v56 }
  0x3b   :  { %v354_v17 = vadd.f32 %v353_v59, %v352_v55  ;;  %v840_v10 = vadd.f32 %v108_v58, %v828_v63  ;;  %v377_v11 = vand.u32 2147483648, %v821_v56  ;;  %507 = vlog2.f32 %v821_v56 }
  0x3c   :  { %v498_v3 = vpop.eup %497  ;;  %vm371_vm6 = vweird.f32 %v821_v56  ;;  %vm846_vm7 = vcmp.eq.f32.partialorder %v375_v13, 8.507059e+37  ;;  %vm114_vm10 = vcmask 261120   ;;  %vm247_vm15 = vcmask 122880  }
  0x3d   :  { %v500_v6 = vpop.eup %499  ;;  %355 = vadd.xlane.f32.xlu1 %v354_v17  ;;  %v172_v8 = vadd.f32 1.0, %v498_v3  ;;  %v175_v9 = vmul.f32 -0.5, %v498_v3  ;;  %v178_v16 = vand.u32 2147483647, %v498_v3  ;;  %v229_v22 = vmul.f32 %v840_v10, %v840_v10  ;;  %435 = vmatmul.msk.f32.vlgmr.msra.gmra.mxu0 %vm114_vm10, %v110_v36 }
  0x3e   :  { %v502_v14 = vpop.eup %501  ;;  %v181_v51 = vadd.f32 1.0, %v500_v6  ;;  %v184_v1 = vmul.f32 -0.5, %v500_v6  ;;  %v187_v26 = vand.u32 2147483647, %v500_v6  ;;  %v378_v57 = vor.u32 1.1754944e-38, %v377_v11 }
  0x3f   :  { %v504_v15 = vpop.eup %503  ;;  %509 = vlog2.f32 %v172_v8  ;;  %v190_v19 = vadd.f32 1.0, %v502_v14  ;;  %v176_v61 = vadd.f32 1.0, %v175_v9  ;;  %v193_v23 = vmul.f32 -0.5, %v502_v14 }
  0x40   :  { %v506_v20 = vpop.eup %505  ;;  %511 = vlog2.f32 %v181_v51  ;;  %v185_v21 = vadd.f32 1.0, %v184_v1  ;;  %v199_v24 = vadd.f32 1.0, %v504_v15  ;;  %v202_v29 = vmul.f32 -0.5, %v504_v15 }
  0x41   :  { %513 = vlog2.f32 %v190_v19  ;;  %v194_v27 = vadd.f32 1.0, %v193_v23  ;;  %vm852_vm8 = vcmp.lt.f32.partialorder %v178_v16, 0.0004427343  ;;  %v196_v12 = vand.u32 2147483647, %v502_v14  ;;  %v508_v31 = vpop.eup %507 }
  0x42   :  { %515 = vlog2.f32 %v199_v24  ;;  %v367_v30 = vmul.f32 %v506_v20, %v821_v56  ;;  %v177_v32 = vmul.f32 %v498_v3, %v176_v61  ;;  %v186_v33 = vmul.f32 %v500_v6, %v185_v21 }
  0x43   :  { %v203_v34 = vadd.f32 1.0, %v202_v29  ;;  %v205_v35 = vand.u32 2147483647, %v504_v15  ;;  %vm372_vm9 = vweird.f32 %v506_v20  ;;  %v230_v39 = vmul.f32 -0.5, %v229_v22 }
  0x44   :  { %v368_v38 = vsub.f32 1.0, %v367_v30  ;;  %vm860_vm11 = vcmp.lt.f32.partialorder %v187_v26, 0.0004427343  ;;  %v195_v60 = vmul.f32 %v502_v14, %v194_v27  ;;  %v365_v7 = vsub.f32 %v840_v10, %v828_v63  ;;  %vm879_vm14 = vmor %vm371_vm6, %vm372_vm9 }
  0x45   :  { %v510_v37 = vpop.eup %509  ;;  %vm866_vm12 = vcmp.lt.f32.partialorder %v196_v12, 0.0004427343  ;;  %v232_v46 = vmul.f32 162753.8, %v230_v39  ;;  %v204_v49 = vmul.f32 %v504_v15, %v203_v34  ;;  %vm872_vm13 = vcmp.lt.f32.partialorder %v205_v35, 0.0004427343 }
  0x46   :  { %v512_v40 = vpop.eup %511  ;;  %v174_v41 = vmul.f32 0.6931472, %v510_v37  ;;  %v369_v45 = vmul.f32 %v506_v20, %v368_v38  ;;  %v384_v16 = vmul.f32 0.6931472, %v508_v31  ;;  %v444_v26 = vadd.f32 -0.9189385, %v230_v39 }
  0x47   :  { %v514_v18 = vpop.eup %513  ;;  %v183_v43 = vmul.f32 0.6931472, %v512_v40  ;;  %v445_v58 = vadd.f32 6.0, %v232_v46  ;;  %vm399_vm2 = vcmask 7168   ;;  %vm401_vm3 = vcmask 8192  }
  0x48   :  { %v180_v47 = vsel %vm852_vm8, %v177_v32, %v174_v41  ;;  %v192_v48 = vmul.f32 0.6931472, %v514_v18  ;;  %v516_v28 = vpop.eup %515  ;;  %v370_v55 = vadd.f32 %v506_v20, %v369_v45  ;;  %v234_v2 = vadd.f32 -0.6931472, %v444_v26 }
  0x49   :  { %v189_v62 = vsel %vm860_vm11, %v186_v33, %v183_v43  ;;  %v208_v54 = vadd.f32 %v180_v47, %v831_v0  ;;  %v201_v63 = vmul.f32 0.6931472, %v516_v28  ;;  %v235_v8 = vmul.f32 1.442695, %v445_v58 }
  0x4a   :  { %v198_v59 = vsel %vm866_vm12, %v195_v60, %v192_v48  ;;  %v209_v17 = vadd.f32 %v189_v62, %v833_v4  ;;  %v374_v6 = vsel %vm879_vm14, %v506_v20, %v370_v55 }
  0x4b   :  { %v210_v56 = vadd.f32 %v198_v59, %v835_v5  ;;  %v212_v3 = vsel %vm138_vm1, %v208_v54, 0.0  ;;  %v207_v9 = vsel %vm872_vm13, %v204_v49, %v201_v63  ;;  %v379_v13 = vsel %vm846_vm7, %v378_v57, %v374_v6 }
  0x4c   :  { %v213_v0 = vsel %vm138_vm1, %v209_v17, 0.0  ;;  %v211_v14 = vadd.f32 %v207_v9, %v837_v53  ;;  %v380_v5 = vmul.f32 %v379_v13, %v365_v7  ;;  %517 = vpow2.f32 %v235_v8 }
  0x4d   :  { %v214_v51 = vadd.f32 %v213_v0, %v212_v3  ;;  %v215_v4 = vsel %vm138_vm1, %v210_v56, 0.0  ;;  %v112_v63 = vperm.slane %v840_v10, 0 }
  0x4e   :  { %v217_v11 = vsel %vm138_vm1, %v211_v14, 0.0  ;;  %v381_v15 = vmul.f32 -0.5, %v380_v5 }
  0x4f   :  { %v216_v1 = vadd.f32 %v215_v4, %v214_v51 }
  0x50   :  { %v382_v20 = vmul.f32 %v381_v15, %v380_v5 }
  0x51   :  { %v218_v19 = vadd.f32 %v217_v11, %v216_v1 }
  0x52   :  { %v385_v61 = vsub.f32 %v382_v20, %v384_v16  ;;  %v518_v21 = vpop.eup %517 }
  0x53   :  { %219 = vadd.xlane.f32.xlu0 %v218_v19  ;;  %v237_v24 = vadd.f32 1.0, %v518_v21  ;;  %v240_v25 = vmul.f32 -0.5, %v518_v21  ;;  %v243_v27 = vand.u32 2147483647, %v518_v21 }
  0x54   :  { %v450_v23 = vadd.f32 -0.9189385, %v385_v61 }
  0x55   :  { %519 = vlog2.f32 %v237_v24  ;;  %v241_v22 = vadd.f32 1.0, %v240_v25  ;;  %vm244_vm0 = vcmp.lt.f32.partialorder %v243_v27, 0.0004427343 }
  0x56   :  { %v387_v53 = vsel %vm247_vm15, %v450_v23, 0.0 }
  0x57   :  { %388 = vadd.xlane.f32.xlu1 %v387_v53  ;;  %v242_v29 = vmul.f32 %v518_v21, %v241_v22 }
  0x5b   :  { %v520_v57 = vpop.eup %519 }
  0x5c   :  { %v239_v12 = vmul.f32 0.6931472, %v520_v57 }
  0x5e   :  { %v245_v30 = vsel %vm244_vm0, %v242_v29, %v239_v12 }
  0x5f   :  { %v246_v31 = vadd.f32 %v245_v30, %v234_v2 }
  0x61   :  { %v248_v32 = vsel %vm247_vm15, %v246_v31, 0.0 }
  0x62   :  { %249 = vadd.xlane.f32.xlu0 %v248_v32 }
  0xb0   :  { %v356_v33 = vpop.xlane.xlu1 %355 }
  0xb1   :  { %v357_v41 = vrot.slane %v356_v33, 4 }
  0xb3   :  { %v358_v7 = vadd.f32 %v357_v41, %v356_v33 }
  0xb5   :  { %v359_v43 = vrot.slane %v358_v7, 2 }
  0xb7   :  { %v360_v48 = vadd.f32 %v359_v43, %v358_v7 }
  0xb9   :  { %v361_v28 = vrot.slane %v360_v48, 1 }
  0xba   :  { %v135_v17 = vpop.f32.mrf.mxu0 }
  0xbb   :  { %v362_v58 = vadd.f32 %v361_v28, %v360_v48  ;;  %v136_v56 = vadd.f32 %v135_v17, %v112_v63 }
  0xbd   :  { %139 = vst.msk [vmem:[#allocation2] sm:$0xff] %vm138_vm1, %v136_v56 }
  0xbe   :  { %413 = dma.vmem_to_hbm [thread:$0]  %s409_s9, 128, %s411_s12, [#allocation3]  }
  0xc6   :  { %v220_v34 = vpop.xlane.xlu0 %219 }
  0xc7   :  { %v221_v35 = vrot.slane %v220_v34, 4 }
  0xc9   :  { %v222_v36 = vadd.f32 %v221_v35, %v220_v34 }
  0xca   :  { %v389_v38 = vpop.xlane.xlu1 %388 }
  0xcb   :  { %v223_v37 = vrot.slane %v222_v36, 2  ;;  %v390_v42 = vrot.slane %v389_v38, 4 }
  0xcd   :  { %v224_v40 = vadd.f32 %v223_v37, %v222_v36  ;;  %v391_v18 = vadd.f32 %v390_v42, %v389_v38 }
  0xcf   :  { %v225_v39 = vrot.slane %v224_v40, 1  ;;  %v392_v45 = vrot.slane %v391_v18, 2 }
  0xd1   :  { %v226_v60 = vadd.f32 %v225_v39, %v224_v40  ;;  %v393_v49 = vadd.f32 %v392_v45, %v391_v18 }
  0xd3   :  { %451 = vpush %v226_v60  ;;  %v394_v54 = vrot.slane %v393_v49, 1 }
  0xd5   :  { %v250_v44 = vpop.xlane.xlu0 %249  ;;  %v395_v59 = vadd.f32 %v394_v54, %v393_v49 }
  0xd6   :  { %v251_v46 = vrot.slane %v250_v44, 4 }
  0xd8   :  { %v252_v47 = vadd.f32 %v251_v46, %v250_v44 }
  0xda   :  { %v253_v50 = vrot.slane %v252_v47, 2 }
  0xdc   :  { %v254_v52 = vadd.f32 %v253_v50, %v252_v47 }
  0xde   :  { %v255_v62 = vrot.slane %v254_v52, 1 }
  0xe0   :  { %v256_v55 = vadd.f32 %v255_v62, %v254_v52 }
  0xe2   :  { %453 = vpush %v256_v55 }
  0xe3   :  { %455 = vpush %v362_v58 }
  0xe4   :  { %457 = vpush %v395_v59 }
 0x104   :  { %s452_s13 = spop %451 }
 0x105   :  { %v228_v3 = vstv %s452_s13 }
 0x113   :  { %s454_s14 = spop %453 }
 0x114   :  { %v258_v6 = vstv %s454_s14  ;;  %s456_s2 = spop %455 }
 0x115   :  { %v259_v8 = vadd.f32 %v258_v6, %v228_v3  ;;  %v364_v9 = vstv %s456_s2  ;;  %s458_s16 = spop %457 }
 0x116   :  { %v397_v10 = vstv %s458_s16 }
 0x117   :  { %v398_v0 = vadd.f32 %v397_v10, %v364_v9 }
 0x119   :  { %v400_v13 = vsel %vm399_vm2, %v259_v8, %v398_v0 }
 0x11a   :  { %402 = vst.msk [vmem:[#allocation4] sm:$0x1] %vm401_vm3, %v400_v13 }
 0x11b   :  { %424 = dma.vmem_to_hbm [thread:$0]  %s420_s15, 16, %s422_s18, [#allocation5]  }
 0x11c   :  { %569 = dma.done.wait [#allocation3], 128  }
 0x11d   :  { %570 = vsyncadd [#allocation3], 4294967168 }
 0x11e   :  { %571 = dma.done.wait [#allocation5], 16  }
 0x11f   :  { %572 = vsyncadd [#allocation5], 4294967280 }
 0x120   :  { %433 = vsyncpa [#allocation3], 1 }
 0x121   :  { %434 = vsyncpa [#allocation5], 1 }

</bundles_post_ra>
